<compile_context>
chip_gen: v5e
topology: v5e:2x2
jax: 0.10.0
libtpu: 0.0.40
codegen_flags: <defaults>
</compile_context>

<pallas_src>
import functools
import math

import jax
import jax.numpy as jnp
import numpy as np
from jax.experimental import pallas as pl
from jax.experimental.pallas import tpu as pltpu


def _round_up(x, m):
    return ((x + m - 1) // m) * m


def _height_maxpool_kernel(x_ref, o_ref, *, W, g):
    # x_ref block: (R, g*2*W). For folded output row j, lanes
    # [2j*W : (2j+1)*W] hold input row 2h and [(2j+1)*W : (2j+2)*W] hold 2h+1.
    x = x_ref[...]
    if g == 1:
        o_ref[...] = jnp.maximum(x[:, :W], x[:, W:])
    else:
        parts = [
            jnp.maximum(x[:, (2 * j) * W:(2 * j + 1) * W],
                        x[:, (2 * j + 1) * W:(2 * j + 2) * W])
            for j in range(g)
        ]
        o_ref[...] = jnp.concatenate(parts, axis=-1)


def _choose_group(M, W):
    """Pick g so that g output rows folded on the lane axis give g*W % 128 == 0."""
    if W % 128 == 0:
        return 1                                   # already lane-dense
    g0 = 128 // math.gcd(W, 128)                   # smallest g with g*W % 128 == 0
    best = None
    g = g0
    while g <= M and g * W <= 8192:                # bounded search
        if M % g == 0:
            best = g
            if g * W >= 512:                       # lane-dense enough; stop
                break
        g += g0
    return best if best is not None else 1         # fallback: correct, lane-sparse


def height_max_pool(x, *, size=(2, 1), stride=(2, 1),
                    max_block_bytes=8 * 1024 * 1024):
    """MaxPool2d(kernel=(2,1), stride=(2,1)) over an NCHW tensor via Pallas."""
    # TODO(synk): only the (2,1)/(2,1) configuration used by the CRNN is implemented.
    assert tuple(size) == (2, 1) and tuple(stride) == (2, 1)
    N, C, H, W = x.shape
    assert H >= 2
    H_out = H // 2
    if H % 2:
        # TODO(synk): odd H pays one extra HBM copy to drop the trailing row.
        x = x[:, :, : H_out * 2, :]

    M = N * C * H_out                              # number of output rows
    itemsize = jnp.dtype(x.dtype).itemsize

    # Fold g output rows into the lane axis (lane-dense blocks).
    g = _choose_group(M, W)
    M2 = M // g
    Lin, Lout = g * 2 * W, g * W
    x2 = x.reshape(M2, Lin)                        # free row-major view (contiguous NCHW)

    # Sublane alignment is dtype-packing aware: 8 (f32) / 16 (bf16) / 32 (int8).
    sub = max(8, 32 // itemsize)
    # Padding-aware VMEM accounting: lanes pad to multiples of 128.
    in_row_bytes = _round_up(Lin, 128) * itemsize
    max_rows = max(sub, max_block_bytes // in_row_bytes)
    R = min(M2, max_rows)
    if R < M2:
        R = max(sub, (R // sub) * sub)
    # Prefer >= 2 grid tiles so both v7x TensorCores stream HBM.
    if -(-M2 // R) == 1 and M2 >= 2 * sub:
        R = _round_up(-(-M2 // 2), sub)

    n_out_elems = M * W
    out2 = pl.pallas_call(
        functools.partial(_height_maxpool_kernel, W=W, g=g),
        out_shape=jax.ShapeDtypeStruct((M2, Lout), x.dtype),
        grid=(pl.cdiv(M2, R),),
        in_specs=[pl.BlockSpec((R, Lin), lambda i: (i, 0))],
        out_specs=pl.BlockSpec((R, Lout), lambda i: (i, 0)),
        compiler_params=pltpu.CompilerParams(
            dimension_semantics=("parallel",),
            vmem_limit_bytes=48 * 1024 * 1024,
        ),
        cost_estimate=pl.CostEstimate(
            flops=n_out_elems,
            transcendentals=0,
            bytes_accessed=3 * n_out_elems * itemsize,
        ),
    )(x2)
    return out2.reshape(N, C, H_out, W)


def ref_height_max_pool(x):
    """Pure-JAX reference of nn.MaxPool2d((2,1),(2,1)) (ceil_mode=False)."""
    N, C, H, W = x.shape
    H_out = H // 2
    xr = x[:, :, : H_out * 2, :].reshape(N, C, H_out, 2, W)
    return jnp.max(xr, axis=3)


if __name__ == "__main__":
    key = jax.random.PRNGKey(0)

    # Main check: CRNN-like small shape.
    N, C, H, W = 2, 4, 16, 16
    x = jax.random.normal(key, (N, C, H, W), jnp.float32)
    out = jax.block_until_ready(height_max_pool(x))
    assert out.shape == (N, C, H // 2, W)
    np.testing.assert_allclose(np.asarray(out),
                               np.asarray(ref_height_max_pool(x)),
                               atol=0, rtol=0)

    # Extra check: bf16 path (dtype-aware alignment, different fold).
    xb = jax.random.normal(jax.random.PRNGKey(1), (2, 8, 32, 16), jnp.bfloat16)
    outb = jax.block_until_ready(height_max_pool(xb))
    np.testing.assert_allclose(np.asarray(outb).astype(np.float32),
                               np.asarray(ref_height_max_pool(xb)).astype(np.float32),
                               atol=0, rtol=0)

    # Extra check: fallback (g=1) path with W not folding cleanly.
    xo = jax.random.normal(jax.random.PRNGKey(2), (1, 3, 6, 20), jnp.float32)
    outo = jax.block_until_ready(height_max_pool(xo))
    np.testing.assert_allclose(np.asarray(outo),
                               np.asarray(ref_height_max_pool(xo)),
                               atol=0, rtol=0)

    print("KERNEL_OK")
</pallas_src>

<mosaic_0001>
module attributes {stable_mosaic.version = 11 : i64} {
  func.func @_height_maxpool_kernel(%arg0: i32, %arg1: memref<2x1024xf32, #tpu.memory_space<vmem>>, %arg2: memref<2x512xf32, #tpu.memory_space<vmem>>) attributes {dimension_semantics = [#tpu.dimension_semantics<parallel>], iteration_bounds = array<i64: 1>, scalar_prefetch = 0 : i64, scratch_operands = 0 : i64, tpu.core_type = #tpu.core_type<tc>, window_params = [{transform_indices = @transform_0, window_bounds = array<i64: 2, 1024>}, {transform_indices = @transform_1, window_bounds = array<i64: 2, 512>}]} {
    %c0 = arith.constant 0 : index
    %c0_0 = arith.constant 0 : index
    %0 = vector.load %arg1[%c0, %c0_0] : memref<2x1024xf32, #tpu.memory_space<vmem>>, vector<2x1024xf32>
    %1 = vector.extract_strided_slice %0 {offsets = [0, 0], sizes = [2, 16], strides = [1, 1]} : vector<2x1024xf32> to vector<2x16xf32>
    %2 = vector.extract_strided_slice %0 {offsets = [0, 16], sizes = [2, 16], strides = [1, 1]} : vector<2x1024xf32> to vector<2x16xf32>
    %3 = arith.maximumf %1, %2 : vector<2x16xf32>
    %4 = vector.extract_strided_slice %0 {offsets = [0, 32], sizes = [2, 16], strides = [1, 1]} : vector<2x1024xf32> to vector<2x16xf32>
    %5 = vector.extract_strided_slice %0 {offsets = [0, 48], sizes = [2, 16], strides = [1, 1]} : vector<2x1024xf32> to vector<2x16xf32>
    %6 = arith.maximumf %4, %5 : vector<2x16xf32>
    %7 = vector.extract_strided_slice %0 {offsets = [0, 64], sizes = [2, 16], strides = [1, 1]} : vector<2x1024xf32> to vector<2x16xf32>
    %8 = vector.extract_strided_slice %0 {offsets = [0, 80], sizes = [2, 16], strides = [1, 1]} : vector<2x1024xf32> to vector<2x16xf32>
    %9 = arith.maximumf %7, %8 : vector<2x16xf32>
    %10 = vector.extract_strided_slice %0 {offsets = [0, 96], sizes = [2, 16], strides = [1, 1]} : vector<2x1024xf32> to vector<2x16xf32>
    %11 = vector.extract_strided_slice %0 {offsets = [0, 112], sizes = [2, 16], strides = [1, 1]} : vector<2x1024xf32> to vector<2x16xf32>
    %12 = arith.maximumf %10, %11 : vector<2x16xf32>
    %13 = vector.extract_strided_slice %0 {offsets = [0, 128], sizes = [2, 16], strides = [1, 1]} : vector<2x1024xf32> to vector<2x16xf32>
    %14 = vector.extract_strided_slice %0 {offsets = [0, 144], sizes = [2, 16], strides = [1, 1]} : vector<2x1024xf32> to vector<2x16xf32>
    %15 = arith.maximumf %13, %14 : vector<2x16xf32>
    %16 = vector.extract_strided_slice %0 {offsets = [0, 160], sizes = [2, 16], strides = [1, 1]} : vector<2x1024xf32> to vector<2x16xf32>
    %17 = vector.extract_strided_slice %0 {offsets = [0, 176], sizes = [2, 16], strides = [1, 1]} : vector<2x1024xf32> to vector<2x16xf32>
    %18 = arith.maximumf %16, %17 : vector<2x16xf32>
    %19 = vector.extract_strided_slice %0 {offsets = [0, 192], sizes = [2, 16], strides = [1, 1]} : vector<2x1024xf32> to vector<2x16xf32>
    %20 = vector.extract_strided_slice %0 {offsets = [0, 208], sizes = [2, 16], strides = [1, 1]} : vector<2x1024xf32> to vector<2x16xf32>
    %21 = arith.maximumf %19, %20 : vector<2x16xf32>
    %22 = vector.extract_strided_slice %0 {offsets = [0, 224], sizes = [2, 16], strides = [1, 1]} : vector<2x1024xf32> to vector<2x16xf32>
    %23 = vector.extract_strided_slice %0 {offsets = [0, 240], sizes = [2, 16], strides = [1, 1]} : vector<2x1024xf32> to vector<2x16xf32>
    %24 = arith.maximumf %22, %23 : vector<2x16xf32>
    %25 = vector.extract_strided_slice %0 {offsets = [0, 256], sizes = [2, 16], strides = [1, 1]} : vector<2x1024xf32> to vector<2x16xf32>
    %26 = vector.extract_strided_slice %0 {offsets = [0, 272], sizes = [2, 16], strides = [1, 1]} : vector<2x1024xf32> to vector<2x16xf32>
    %27 = arith.maximumf %25, %26 : vector<2x16xf32>
    %28 = vector.extract_strided_slice %0 {offsets = [0, 288], sizes = [2, 16], strides = [1, 1]} : vector<2x1024xf32> to vector<2x16xf32>
    %29 = vector.extract_strided_slice %0 {offsets = [0, 304], sizes = [2, 16], strides = [1, 1]} : vector<2x1024xf32> to vector<2x16xf32>
    %30 = arith.maximumf %28, %29 : vector<2x16xf32>
    %31 = vector.extract_strided_slice %0 {offsets = [0, 320], sizes = [2, 16], strides = [1, 1]} : vector<2x1024xf32> to vector<2x16xf32>
    %32 = vector.extract_strided_slice %0 {offsets = [0, 336], sizes = [2, 16], strides = [1, 1]} : vector<2x1024xf32> to vector<2x16xf32>
    %33 = arith.maximumf %31, %32 : vector<2x16xf32>
    %34 = vector.extract_strided_slice %0 {offsets = [0, 352], sizes = [2, 16], strides = [1, 1]} : vector<2x1024xf32> to vector<2x16xf32>
    %35 = vector.extract_strided_slice %0 {offsets = [0, 368], sizes = [2, 16], strides = [1, 1]} : vector<2x1024xf32> to vector<2x16xf32>
    %36 = arith.maximumf %34, %35 : vector<2x16xf32>
    %37 = vector.extract_strided_slice %0 {offsets = [0, 384], sizes = [2, 16], strides = [1, 1]} : vector<2x1024xf32> to vector<2x16xf32>
    %38 = vector.extract_strided_slice %0 {offsets = [0, 400], sizes = [2, 16], strides = [1, 1]} : vector<2x1024xf32> to vector<2x16xf32>
    %39 = arith.maximumf %37, %38 : vector<2x16xf32>
    %40 = vector.extract_strided_slice %0 {offsets = [0, 416], sizes = [2, 16], strides = [1, 1]} : vector<2x1024xf32> to vector<2x16xf32>
    %41 = vector.extract_strided_slice %0 {offsets = [0, 432], sizes = [2, 16], strides = [1, 1]} : vector<2x1024xf32> to vector<2x16xf32>
    %42 = arith.maximumf %40, %41 : vector<2x16xf32>
    %43 = vector.extract_strided_slice %0 {offsets = [0, 448], sizes = [2, 16], strides = [1, 1]} : vector<2x1024xf32> to vector<2x16xf32>
    %44 = vector.extract_strided_slice %0 {offsets = [0, 464], sizes = [2, 16], strides = [1, 1]} : vector<2x1024xf32> to vector<2x16xf32>
    %45 = arith.maximumf %43, %44 : vector<2x16xf32>
    %46 = vector.extract_strided_slice %0 {offsets = [0, 480], sizes = [2, 16], strides = [1, 1]} : vector<2x1024xf32> to vector<2x16xf32>
    %47 = vector.extract_strided_slice %0 {offsets = [0, 496], sizes = [2, 16], strides = [1, 1]} : vector<2x1024xf32> to vector<2x16xf32>
    %48 = arith.maximumf %46, %47 : vector<2x16xf32>
    %49 = vector.extract_strided_slice %0 {offsets = [0, 512], sizes = [2, 16], strides = [1, 1]} : vector<2x1024xf32> to vector<2x16xf32>
    %50 = vector.extract_strided_slice %0 {offsets = [0, 528], sizes = [2, 16], strides = [1, 1]} : vector<2x1024xf32> to vector<2x16xf32>
    %51 = arith.maximumf %49, %50 : vector<2x16xf32>
    %52 = vector.extract_strided_slice %0 {offsets = [0, 544], sizes = [2, 16], strides = [1, 1]} : vector<2x1024xf32> to vector<2x16xf32>
    %53 = vector.extract_strided_slice %0 {offsets = [0, 560], sizes = [2, 16], strides = [1, 1]} : vector<2x1024xf32> to vector<2x16xf32>
    %54 = arith.maximumf %52, %53 : vector<2x16xf32>
    %55 = vector.extract_strided_slice %0 {offsets = [0, 576], sizes = [2, 16], strides = [1, 1]} : vector<2x1024xf32> to vector<2x16xf32>
    %56 = vector.extract_strided_slice %0 {offsets = [0, 592], sizes = [2, 16], strides = [1, 1]} : vector<2x1024xf32> to vector<2x16xf32>
    %57 = arith.maximumf %55, %56 : vector<2x16xf32>
    %58 = vector.extract_strided_slice %0 {offsets = [0, 608], sizes = [2, 16], strides = [1, 1]} : vector<2x1024xf32> to vector<2x16xf32>
    %59 = vector.extract_strided_slice %0 {offsets = [0, 624], sizes = [2, 16], strides = [1, 1]} : vector<2x1024xf32> to vector<2x16xf32>
    %60 = arith.maximumf %58, %59 : vector<2x16xf32>
    %61 = vector.extract_strided_slice %0 {offsets = [0, 640], sizes = [2, 16], strides = [1, 1]} : vector<2x1024xf32> to vector<2x16xf32>
    %62 = vector.extract_strided_slice %0 {offsets = [0, 656], sizes = [2, 16], strides = [1, 1]} : vector<2x1024xf32> to vector<2x16xf32>
    %63 = arith.maximumf %61, %62 : vector<2x16xf32>
    %64 = vector.extract_strided_slice %0 {offsets = [0, 672], sizes = [2, 16], strides = [1, 1]} : vector<2x1024xf32> to vector<2x16xf32>
    %65 = vector.extract_strided_slice %0 {offsets = [0, 688], sizes = [2, 16], strides = [1, 1]} : vector<2x1024xf32> to vector<2x16xf32>
    %66 = arith.maximumf %64, %65 : vector<2x16xf32>
    %67 = vector.extract_strided_slice %0 {offsets = [0, 704], sizes = [2, 16], strides = [1, 1]} : vector<2x1024xf32> to vector<2x16xf32>
    %68 = vector.extract_strided_slice %0 {offsets = [0, 720], sizes = [2, 16], strides = [1, 1]} : vector<2x1024xf32> to vector<2x16xf32>
    %69 = arith.maximumf %67, %68 : vector<2x16xf32>
    %70 = vector.extract_strided_slice %0 {offsets = [0, 736], sizes = [2, 16], strides = [1, 1]} : vector<2x1024xf32> to vector<2x16xf32>
    %71 = vector.extract_strided_slice %0 {offsets = [0, 752], sizes = [2, 16], strides = [1, 1]} : vector<2x1024xf32> to vector<2x16xf32>
    %72 = arith.maximumf %70, %71 : vector<2x16xf32>
    %73 = vector.extract_strided_slice %0 {offsets = [0, 768], sizes = [2, 16], strides = [1, 1]} : vector<2x1024xf32> to vector<2x16xf32>
    %74 = vector.extract_strided_slice %0 {offsets = [0, 784], sizes = [2, 16], strides = [1, 1]} : vector<2x1024xf32> to vector<2x16xf32>
    %75 = arith.maximumf %73, %74 : vector<2x16xf32>
    %76 = vector.extract_strided_slice %0 {offsets = [0, 800], sizes = [2, 16], strides = [1, 1]} : vector<2x1024xf32> to vector<2x16xf32>
    %77 = vector.extract_strided_slice %0 {offsets = [0, 816], sizes = [2, 16], strides = [1, 1]} : vector<2x1024xf32> to vector<2x16xf32>
    %78 = arith.maximumf %76, %77 : vector<2x16xf32>
    %79 = vector.extract_strided_slice %0 {offsets = [0, 832], sizes = [2, 16], strides = [1, 1]} : vector<2x1024xf32> to vector<2x16xf32>
    %80 = vector.extract_strided_slice %0 {offsets = [0, 848], sizes = [2, 16], strides = [1, 1]} : vector<2x1024xf32> to vector<2x16xf32>
    %81 = arith.maximumf %79, %80 : vector<2x16xf32>
    %82 = vector.extract_strided_slice %0 {offsets = [0, 864], sizes = [2, 16], strides = [1, 1]} : vector<2x1024xf32> to vector<2x16xf32>
    %83 = vector.extract_strided_slice %0 {offsets = [0, 880], sizes = [2, 16], strides = [1, 1]} : vector<2x1024xf32> to vector<2x16xf32>
    %84 = arith.maximumf %82, %83 : vector<2x16xf32>
    %85 = vector.extract_strided_slice %0 {offsets = [0, 896], sizes = [2, 16], strides = [1, 1]} : vector<2x1024xf32> to vector<2x16xf32>
    %86 = vector.extract_strided_slice %0 {offsets = [0, 912], sizes = [2, 16], strides = [1, 1]} : vector<2x1024xf32> to vector<2x16xf32>
    %87 = arith.maximumf %85, %86 : vector<2x16xf32>
    %88 = vector.extract_strided_slice %0 {offsets = [0, 928], sizes = [2, 16], strides = [1, 1]} : vector<2x1024xf32> to vector<2x16xf32>
    %89 = vector.extract_strided_slice %0 {offsets = [0, 944], sizes = [2, 16], strides = [1, 1]} : vector<2x1024xf32> to vector<2x16xf32>
    %90 = arith.maximumf %88, %89 : vector<2x16xf32>
    %91 = vector.extract_strided_slice %0 {offsets = [0, 960], sizes = [2, 16], strides = [1, 1]} : vector<2x1024xf32> to vector<2x16xf32>
    %92 = vector.extract_strided_slice %0 {offsets = [0, 976], sizes = [2, 16], strides = [1, 1]} : vector<2x1024xf32> to vector<2x16xf32>
    %93 = arith.maximumf %91, %92 : vector<2x16xf32>
    %94 = vector.extract_strided_slice %0 {offsets = [0, 992], sizes = [2, 16], strides = [1, 1]} : vector<2x1024xf32> to vector<2x16xf32>
    %95 = vector.extract_strided_slice %0 {offsets = [0, 1008], sizes = [2, 16], strides = [1, 1]} : vector<2x1024xf32> to vector<2x16xf32>
    %96 = arith.maximumf %94, %95 : vector<2x16xf32>
    %97 = tpu.concatenate %3, %6, %9, %12, %15, %18, %21, %24, %27, %30, %33, %36, %39, %42, %45, %48 in 1 : vector<2x16xf32>, vector<2x16xf32>, vector<2x16xf32>, vector<2x16xf32>, vector<2x16xf32>, vector<2x16xf32>, vector<2x16xf32>, vector<2x16xf32>, vector<2x16xf32>, vector<2x16xf32>, vector<2x16xf32>, vector<2x16xf32>, vector<2x16xf32>, vector<2x16xf32>, vector<2x16xf32>, vector<2x16xf32> -> vector<2x256xf32>
    %98 = tpu.concatenate %51, %54, %57, %60, %63, %66, %69, %72, %75, %78, %81, %84, %87, %90, %93, %96 in 1 : vector<2x16xf32>, vector<2x16xf32>, vector<2x16xf32>, vector<2x16xf32>, vector<2x16xf32>, vector<2x16xf32>, vector<2x16xf32>, vector<2x16xf32>, vector<2x16xf32>, vector<2x16xf32>, vector<2x16xf32>, vector<2x16xf32>, vector<2x16xf32>, vector<2x16xf32>, vector<2x16xf32>, vector<2x16xf32> -> vector<2x256xf32>
    %99 = tpu.concatenate %97, %98 in 1 : vector<2x256xf32>, vector<2x256xf32> -> vector<2x512xf32>
    %c0_1 = arith.constant 0 : index
    %c0_2 = arith.constant 0 : index
    %100 = vector.load %arg2[%c0_1, %c0_2] : memref<2x512xf32, #tpu.memory_space<vmem>>, vector<2x512xf32>
    tpu.vector_store %arg2[%c0_1, %c0_2], %99 {strides = array<i32>} : memref<2x512xf32, #tpu.memory_space<vmem>>, vector<2x512xf32>,
    return
  }
  func.func @transform_0(%arg0: i32) -> (i32, i32) {
    %c0_i32 = arith.constant 0 : i32
    %c0_i32_0 = arith.constant 0 : i32
    return %arg0, %c0_i32 : i32, i32
  }
  func.func @transform_1(%arg0: i32) -> (i32, i32) {
    %c0_i32 = arith.constant 0 : i32
    %c0_i32_0 = arith.constant 0 : i32
    return %arg0, %c0_i32 : i32, i32
  }
}

</mosaic_0001>

<bundles_post_ra>
// kernel: tpu_custom_call.1
= control target key start
LH: loop header
LB: loop body
LE: loop exit
PB: predicated region body
PF: predicated region fallthrough
CT: control target
= control target key end

     0   :  { %6 = vsyncpa [#allocation3], 0  ;;  %s606_s0 = inlined_call_operand.hbm [shape: f32[2,1024], index: 0, kind: input, shape index: {}]   ;;  %s607_s1 = inlined_call_operand.hbm [shape: f32[2,512], index: 1, kind: output, shape index: {}]  }
   0x1   :  { %7 = vsyncpa [#allocation4], 0  ;;  %s13_s8 = sshll.u32 %s606_s0, 4  ;;  %s471_s9 = smov [#allocation2]   ;;  %s14_s8 = int_to_ptr.hbm [resolvable:$true] %s13_s8 }
   0x2   :  { %s15_s10 = sshll.u32 %s471_s9, 4  ;;  %s16_s10 = int_to_ptr.vmem [resolvable:$true] %s15_s10 }
   0x3   :  { %18 = dma.hbm_to_vmem [thread:$0]  %s14_s8, 256, %s16_s10, [#allocation3]  }
   0x4   :  { %467 = dma.done.wait [#allocation3], 256  }
   0x5   :  { %468 = vsyncadd [#allocation3], 4294967040  ;;  %v493_v0 = vld [vmem:[#allocation2] sm:$0xff]  ;;  %s472_s11 = smov 112   ;;  %s473_s12 = smov 80   ;;  %v507_v1 = vld [vmem:[#allocation2 + $0x8] sm:$0xff] }
   0x6   :  { %26 = vrot.lane.b32.xlu0 %v493_v0, %s472_s11  ;;  %39 = vrot.lane.b32.xlu1 %v493_v0, %s473_s12  ;;  %s474_s13 = smov 48   ;;  %s475_s0 = smov 96   ;;  %v30_v6 = vrot.slane %v493_v0, 2  ;;  %v82_v40 = vrot.slane %v493_v0, 6  ;;  %v107_v61 = vrot.slane %v507_v1, 2  ;;  %vm261_vm0 = vcmask 130048  }
   0x7   :  { %48 = vrot.lane.b32.xlu2 %v493_v0, %s474_s13  ;;  %s476_s14 = smov 64   ;;  %s477_s15 = smov 32   ;;  %vm263_vm1 = vcmask 261120   ;;  %vm265_vm2 = vcmask 392192   ;;  %vm267_vm3 = vcmask 523264   ;;  %vm269_vm4 = vcmask 654336  }
   0x8   :  { %s478_s16 = smov 16   ;;  %vm271_vm5 = vcmask 785408   ;;  %vm273_vm6 = vcmask 916480   ;;  %vm385_vm7 = vcmask 1041408   ;;  %vm387_vm8 = vcmask 1045508   ;;  %s479_s17 = smov [#allocation5]  }
   0x9   :  { %s398_s18 = sshll.u32 %s479_s17, 4  ;;  %s400_s21 = sshll.u32 %s607_s1, 4  ;;  %vm389_vm9 = vcmask 1043456   ;;  %s399_s18 = int_to_ptr.vmem [resolvable:$true] %s398_s18  ;;  %s401_s21 = int_to_ptr.hbm [resolvable:$true] %s400_s21 }
   0xe   :  { %35 = vrot.lane.b32.xlu0 %v493_v0, %s475_s0  ;;  %44 = vrot.lane.b32.xlu1 %v493_v0, %s476_s14 }
   0xf   :  { %53 = vrot.lane.b32.xlu2 %v493_v0, %s477_s15 }
  0x16   :  { %57 = vrot.lane.b32.xlu0 %v493_v0, %s478_s16  ;;  %103 = vrot.lane.b32.xlu1 %v507_v1, %s472_s11 }
  0x17   :  { %112 = vrot.lane.b32.xlu2 %v507_v1, %s475_s0 }
  0x1e   :  { %116 = vrot.lane.b32.xlu0 %v507_v1, %s473_s12  ;;  %121 = vrot.lane.b32.xlu1 %v507_v1, %s476_s14 }
  0x1f   :  { %125 = vrot.lane.b32.xlu2 %v507_v1, %s474_s13 }
  0x26   :  { %130 = vrot.lane.b32.xlu0 %v507_v1, %s477_s15  ;;  %134 = vrot.lane.b32.xlu1 %v507_v1, %s478_s16 }
  0x61   :  { %v49_v14 = vpop.permute.xlu2 %48 }
  0x62   :  { %v50_v18 = vrot.slane %v49_v14, 2  ;;  %v74_v32 = vrot.slane %v49_v14, 4  ;;  %v94_v48 = vrot.slane %v49_v14, 6 }
  0x69   :  { %v54_v21 = vpop.permute.xlu2 %53 }
  0x6a   :  { %v55_v24 = vrot.slane %v54_v21, 2  ;;  %v77_v36 = vrot.slane %v54_v21, 4  ;;  %v97_v52 = vrot.slane %v54_v21, 6 }
  0x71   :  { %v113_v63 = vpop.permute.xlu2 %112 }
  0x78   :  { %v525_v2 = vpop.permute.xlu0 %26  ;;  %v40_v8 = vpop.permute.xlu1 %39 }
  0x79   :  { %v529_v3 = vmax.f32 %v493_v0, %v525_v2  ;;  %v32_v7 = vrot.slane %v525_v2, 2  ;;  %v41_v12 = vrot.slane %v40_v8, 2  ;;  %v69_v28 = vrot.slane %v40_v8, 4 }
  0x7a   :  { %v84_v41 = vrot.slane %v525_v2, 6  ;;  %v89_v44 = vrot.slane %v40_v8, 6 }
  0x7b   :  { %180 = vst [vmem:[#allocation1] ss:$4 sm:$0xff] %v529_v3  ;;  %v34_v10 = vmax.f32 %v30_v6, %v32_v7  ;;  %v114_v7 = vrot.slane %v113_v63, 2 }
  0x7c   :  { %v86_v42 = vmax.f32 %v82_v40, %v84_v41 }
  0x80   :  { %v36_v9 = vpop.permute.xlu0 %35  ;;  %v45_v16 = vpop.permute.xlu1 %44 }
  0x81   :  { %v37_v13 = vrot.slane %v36_v9, 2  ;;  %v46_v19 = vrot.slane %v45_v16, 2  ;;  %v67_v29 = vrot.slane %v36_v9, 4  ;;  %v72_v33 = vrot.slane %v45_v16, 4 }
  0x82   :  { %v181_v4 = vld.sshfl [vmem:[#allocation1] sm:$0xff pattern:$0x73625140]  ;;  %v87_v45 = vrot.slane %v36_v9, 6  ;;  %v92_v49 = vrot.slane %v45_v16, 6 }
  0x83   :  { %185 = vst [vmem:[#allocation1] ss:$4 sm:$0xff] %v529_v3  ;;  %182 = vrot.lane.b32.xlu2 %v181_v4, %s472_s11  ;;  %v43_v15 = vmax.f32 %v37_v13, %v41_v12  ;;  %v52_v20 = vmax.f32 %v46_v19, %v50_v18  ;;  %v71_v30 = vmax.f32 %v67_v29, %v69_v28 }
  0x84   :  { %v76_v34 = vmax.f32 %v72_v33, %v74_v32  ;;  %v91_v46 = vmax.f32 %v87_v45, %v89_v44  ;;  %v96_v50 = vmax.f32 %v92_v49, %v94_v48 }
  0x88   :  { %v58_v22 = vpop.permute.xlu0 %57  ;;  %v551_v56 = vpop.permute.xlu1 %103 }
  0x89   :  { %v59_v25 = vrot.slane %v58_v22, 2  ;;  %v79_v37 = vrot.slane %v58_v22, 4  ;;  %v99_v53 = vrot.slane %v58_v22, 6  ;;  %v555_v57 = vmax.f32 %v507_v1, %v551_v56 }
  0x8a   :  { %v186_v5 = vld.sshfl [vmem:[#allocation1] sm:$0xff pattern:$0x73625140]  ;;  %v109_v62 = vrot.slane %v551_v56, 2 }
  0x8b   :  { %190 = vst [vmem:[#allocation1] ss:$4 sm:$0xff] %v529_v3  ;;  %187 = vrot.lane.b32.xlu0 %v186_v5, %s475_s0  ;;  %v61_v26 = vmax.f32 %v55_v24, %v59_v25  ;;  %v81_v38 = vmax.f32 %v77_v36, %v79_v37  ;;  %v101_v54 = vmax.f32 %v97_v52, %v99_v53  ;;  %v161_v36 = vrot.slane %v551_v56, 6 }
  0x8c   :  { %v111_v4 = vmax.f32 %v107_v61, %v109_v62 }
  0x90   :  { %v117_v5 = vpop.permute.xlu0 %116 }
  0x91   :  { %v118_v8 = vrot.slane %v117_v5, 2  ;;  %v146_v24 = vrot.slane %v117_v5, 4  ;;  %v166_v40 = vrot.slane %v117_v5, 6 }
  0x92   :  { %v191_v11 = vld.sshfl [vmem:[#allocation1] sm:$0xff pattern:$0x73625140] }
  0x93   :  { %196 = vst [vmem:[#allocation1] ss:$4 sm:$0xff] %v34_v10  ;;  %192 = vrot.lane.b32.xlu1 %v191_v11, %s473_s12  ;;  %v120_v9 = vmax.f32 %v114_v7, %v118_v8  ;;  %v122_v10 = vpop.permute.xlu1 %121  ;;  %v126_v11 = vpop.permute.xlu2 %125 }
  0x94   :  { %v127_v13 = vrot.slane %v126_v11, 2  ;;  %v123_v14 = vrot.slane %v122_v10, 2  ;;  %v149_v28 = vrot.slane %v122_v10, 4  ;;  %v169_v44 = vrot.slane %v122_v10, 6 }
  0x98   :  { %v131_v16 = vpop.permute.xlu0 %130 }
  0x99   :  { %v132_v19 = vrot.slane %v131_v16, 2 }
  0x9a   :  { %v197_v17 = vld.sshfl [vmem:[#allocation1] sm:$0xff pattern:$0x73625140] }
  0x9b   :  { %202 = vst [vmem:[#allocation1] ss:$4 sm:$0xff] %v43_v15  ;;  %198 = vrot.lane.b32.xlu2 %v197_v17, %s476_s14  ;;  %v129_v15 = vmax.f32 %v123_v14, %v127_v13  ;;  %v135_v17 = vpop.permute.xlu1 %134 }
  0x9c   :  { %v156_v32 = vrot.slane %v135_v17, 4  ;;  %v176_v48 = vrot.slane %v135_v17, 6 }
  0xa2   :  { %v203_v23 = vld.sshfl [vmem:[#allocation1] sm:$0xff pattern:$0x73625140] }
  0xa3   :  { %208 = vst [vmem:[#allocation1] ss:$4 sm:$0xff] %v52_v20  ;;  %204 = vrot.lane.b32.xlu0 %v203_v23, %s473_s12  ;;  %v136_v20 = vrot.slane %v135_v17, 2  ;;  %v144_v23 = vrot.slane %v113_v63, 4  ;;  %v139_v17 = vrot.slane %v507_v1, 4 }
  0xa5   :  { %v138_v21 = vmax.f32 %v132_v19, %v136_v20  ;;  %v148_v25 = vmax.f32 %v144_v23, %v146_v24  ;;  %v62_v19 = vrot.slane %v493_v0, 4 }
  0xaa   :  { %v209_v27 = vld.sshfl [vmem:[#allocation1] sm:$0xff pattern:$0x73625140] }
  0xab   :  { %214 = vst [vmem:[#allocation1] ss:$4 sm:$0xff] %v61_v26  ;;  %210 = vrot.lane.b32.xlu1 %v209_v27, %s475_s0  ;;  %v151_v27 = vrot.slane %v126_v11, 4 }
  0xad   :  { %v153_v29 = vmax.f32 %v149_v28, %v151_v27 }
  0xb2   :  { %v215_v31 = vld.sshfl [vmem:[#allocation1] sm:$0xff pattern:$0x73625140] }
  0xb3   :  { %220 = vst [vmem:[#allocation1] ss:$4 sm:$0xff] %v71_v30  ;;  %216 = vrot.lane.b32.xlu2 %v215_v31, %s472_s11  ;;  %v154_v31 = vrot.slane %v131_v16, 4 }
  0xb5   :  { %v158_v33 = vmax.f32 %v154_v31, %v156_v32 }
  0xba   :  { %v221_v35 = vld.sshfl [vmem:[#allocation1] sm:$0xff pattern:$0x73625140] }
  0xbb   :  { %226 = vst [vmem:[#allocation1] ss:$4 sm:$0xff] %v76_v34  ;;  %222 = vrot.lane.b32.xlu0 %v221_v35, %s478_s16  ;;  %v159_v35 = vrot.slane %v507_v1, 6 }
  0xbd   :  { %v163_v37 = vmax.f32 %v159_v35, %v161_v36 }
  0xc2   :  { %v227_v39 = vld.sshfl [vmem:[#allocation1] sm:$0xff pattern:$0x73625140] }
  0xc3   :  { %232 = vst [vmem:[#allocation1] ss:$4 sm:$0xff] %v81_v38  ;;  %228 = vrot.lane.b32.xlu1 %v227_v39, %s477_s15  ;;  %v164_v39 = vrot.slane %v113_v63, 6 }
  0xc5   :  { %v168_v41 = vmax.f32 %v164_v39, %v166_v40 }
  0xca   :  { %v233_v43 = vld.sshfl [vmem:[#allocation1] sm:$0xff pattern:$0x73625140] }
  0xcb   :  { %234 = vrot.lane.b32.xlu2 %v233_v43, %s474_s13  ;;  %238 = vst [vmem:[#allocation1] ss:$4 sm:$0xff] %v86_v42  ;;  %v171_v43 = vrot.slane %v126_v11, 6 }
  0xcd   :  { %v173_v45 = vmax.f32 %v169_v44, %v171_v43 }
  0xd2   :  { %v239_v47 = vld.sshfl [vmem:[#allocation1] sm:$0xff pattern:$0x73625140] }
  0xd3   :  { %240 = vrot.lane.b32.xlu0 %v239_v47, %s476_s14  ;;  %244 = vst [vmem:[#allocation1] ss:$4 sm:$0xff] %v91_v46  ;;  %v174_v47 = vrot.slane %v131_v16, 6  ;;  %v141_v16 = vrot.slane %v551_v56, 4 }
  0xd5   :  { %v178_v49 = vmax.f32 %v174_v47, %v176_v48 }
  0xda   :  { %v245_v51 = vld.sshfl [vmem:[#allocation1] sm:$0xff pattern:$0x73625140] }
  0xdb   :  { %246 = vrot.lane.b32.xlu0 %v245_v51, %s473_s12  ;;  %250 = vst [vmem:[#allocation1] ss:$4 sm:$0xff] %v96_v50 }
  0xdd   :  { %v183_v53 = vpop.permute.xlu2 %182 }
  0xde   :  { %v262_v27 = vsel %vm261_vm0, %v529_v3, %v183_v53 }
  0xe2   :  { %v251_v55 = vld.sshfl [vmem:[#allocation1] sm:$0xff pattern:$0x73625140] }
  0xe3   :  { %252 = vrot.lane.b32.xlu0 %v251_v55, %s475_s0  ;;  %256 = vst [vmem:[#allocation1] ss:$4 sm:$0xff] %v101_v54 }
  0xea   :  { %v557_v58 = vld.sshfl [vmem:[#allocation1] sm:$0xff pattern:$0x73625140] }
  0xeb   :  { %283 = vst [vmem:[#allocation1] ss:$4 sm:$0xff] %v555_v57 }
  0xf2   :  { %v284_v59 = vld.sshfl [vmem:[#allocation1] sm:$0xff pattern:$0x73625140] }
  0xf3   :  { %285 = vrot.lane.b32.xlu1 %v284_v59, %s472_s11  ;;  %288 = vst [vmem:[#allocation1] ss:$4 sm:$0xff] %v555_v57 }
  0xfa   :  { %v289_v60 = vld.sshfl [vmem:[#allocation1] sm:$0xff pattern:$0x73625140] }
  0xfb   :  { %290 = vrot.lane.b32.xlu0 %v289_v60, %s475_s0  ;;  %293 = vst [vmem:[#allocation1] ss:$4 sm:$0xff] %v555_v57 }
  0xfd   :  { %v188_v54 = vpop.permute.xlu0 %187 }
 0x102   :  { %v294_v6 = vld.sshfl [vmem:[#allocation1] sm:$0xff pattern:$0x73625140] }
 0x103   :  { %295 = vrot.lane.b32.xlu2 %v294_v6, %s473_s12  ;;  %299 = vst [vmem:[#allocation1] ss:$4 sm:$0xff] %v111_v4 }
 0x105   :  { %v193_v52 = vpop.permute.xlu1 %192 }
 0x10a   :  { %v300_v12 = vld.sshfl [vmem:[#allocation1] sm:$0xff pattern:$0x73625140] }
 0x10b   :  { %301 = vrot.lane.b32.xlu1 %v300_v12, %s476_s14  ;;  %305 = vst [vmem:[#allocation1] ss:$4 sm:$0xff] %v120_v9 }
 0x112   :  { %v306_v18 = vld.sshfl [vmem:[#allocation1] sm:$0xff pattern:$0x73625140] }
 0x113   :  { %307 = vrot.lane.b32.xlu1 %v306_v18, %s473_s12  ;;  %311 = vst [vmem:[#allocation1] ss:$4 sm:$0xff] %v129_v15  ;;  %v64_v18 = vrot.slane %v525_v2, 4 }
 0x115   :  { %v205_v59 = vpop.permute.xlu0 %204 }
 0x11a   :  { %v312_v22 = vld.sshfl [vmem:[#allocation1] sm:$0xff pattern:$0x73625140] }
 0x11b   :  { %313 = vrot.lane.b32.xlu1 %v312_v22, %s475_s0  ;;  %317 = vst [vmem:[#allocation1] ss:$4 sm:$0xff] %v138_v21  ;;  %v143_v21 = vmax.f32 %v139_v17, %v141_v16  ;;  %v66_v22 = vmax.f32 %v62_v19, %v64_v18 }
 0x11d   :  { %v211_v55 = vpop.permute.xlu1 %210 }
 0x122   :  { %v318_v26 = vld.sshfl [vmem:[#allocation1] sm:$0xff pattern:$0x73625140] }
 0x123   :  { %323 = vst [vmem:[#allocation1] ss:$4 sm:$0xff] %v148_v25 }
 0x12a   :  { %v324_v30 = vld.sshfl [vmem:[#allocation1] sm:$0xff pattern:$0x73625140] }
 0x12b   :  { %325 = vrot.lane.b32.xlu2 %v324_v30, %s478_s16  ;;  %329 = vst [vmem:[#allocation1] ss:$4 sm:$0xff] %v153_v29  ;;  %v264_v29 = vsel %vm263_vm1, %v262_v27, %v188_v54 }
 0x12c   :  { %v266_v30 = vsel %vm265_vm2, %v264_v29, %v193_v52 }
 0x12d   :  { %v223_v62 = vpop.permute.xlu0 %222 }
 0x12e   :  { %v275_v56 = vsel %vm261_vm0, %v66_v22, %v223_v62 }
 0x132   :  { %v330_v34 = vld.sshfl [vmem:[#allocation1] sm:$0xff pattern:$0x73625140] }
 0x133   :  { %331 = vrot.lane.b32.xlu1 %v330_v34, %s477_s15  ;;  %335 = vst [vmem:[#allocation1] ss:$4 sm:$0xff] %v158_v33 }
 0x135   :  { %v229_v60 = vpop.permute.xlu1 %228 }
 0x136   :  { %v276_v0 = vsel %vm263_vm1, %v275_v56, %v229_v60 }
 0x13a   :  { %v336_v38 = vld.sshfl [vmem:[#allocation1] sm:$0xff pattern:$0x73625140] }
 0x13b   :  { %319 = vrot.lane.b32.xlu1 %v318_v26, %s472_s11  ;;  %337 = vrot.lane.b32.xlu0 %v336_v38, %s474_s13  ;;  %341 = vst [vmem:[#allocation1] ss:$4 sm:$0xff] %v163_v37 }
 0x142   :  { %v342_v42 = vld.sshfl [vmem:[#allocation1] sm:$0xff pattern:$0x73625140] }
 0x143   :  { %258 = vrot.lane.b32.xlu0 %v557_v58, %s472_s11  ;;  %343 = vrot.lane.b32.xlu2 %v342_v42, %s476_s14  ;;  %347 = vst [vmem:[#allocation1] ss:$4 sm:$0xff] %v168_v41  ;;  %v199_v58 = vpop.permute.xlu2 %198 }
 0x144   :  { %v268_v3 = vsel %vm267_vm3, %v266_v30, %v199_v58 }
 0x145   :  { %v241_v5 = vpop.permute.xlu0 %240  ;;  %v270_v38 = vsel %vm269_vm4, %v268_v3, %v205_v59 }
 0x146   :  { %v272_v41 = vsel %vm271_vm5, %v270_v38, %v211_v55 }
 0x14a   :  { %v348_v46 = vld.sshfl [vmem:[#allocation1] sm:$0xff pattern:$0x73625140] }
 0x14b   :  { %349 = vrot.lane.b32.xlu2 %v348_v46, %s473_s12  ;;  %353 = vst [vmem:[#allocation1] ss:$4 sm:$0xff] %v173_v45  ;;  %v582_v61 = vpop.permute.xlu2 %216 }
 0x14d   :  { %v247_v8 = vpop.permute.xlu0 %246 }
 0x152   :  { %v354_v50 = vld.sshfl [vmem:[#allocation1] sm:$0xff pattern:$0x73625140] }
 0x153   :  { %355 = vrot.lane.b32.xlu2 %v354_v50, %s475_s0  ;;  %359 = vst [vmem:[#allocation1] ss:$4 sm:$0xff] %v178_v49  ;;  %v235_v4 = vpop.permute.xlu2 %234  ;;  %v274_v50 = vsel %vm273_vm6, %v272_v41, %v582_v61 }
 0x155   :  { %v253_v11 = vpop.permute.xlu0 %252 }
 0x15a   :  { %v360_v51 = vld.sshfl [vmem:[#allocation1] sm:$0xff pattern:$0x73625140] }
 0x15b   :  { %361 = vrot.lane.b32.xlu2 %v360_v51, %s472_s11 }
 0x15d   :  { %v296_v7 = vpop.permute.xlu2 %295 }
 0x165   :  { %v286_v63 = vpop.permute.xlu1 %285 }
 0x166   :  { %v364_v24 = vsel %vm261_vm0, %v555_v57, %v286_v63  ;;  %v277_v57 = vsel %vm265_vm2, %v276_v0, %v235_v4 }
 0x167   :  { %v278_v35 = vsel %vm267_vm3, %v277_v57, %v241_v5 }
 0x168   :  { %v279_v39 = vsel %vm269_vm4, %v278_v35, %v247_v8 }
 0x169   :  { %v280_v42 = vsel %vm271_vm5, %v279_v39, %v253_v11 }
 0x16d   :  { %v291_v14 = vpop.permute.xlu0 %290 }
 0x16e   :  { %v365_v28 = vsel %vm263_vm1, %v364_v24, %v291_v14 }
 0x16f   :  { %v366_v32 = vsel %vm265_vm2, %v365_v28, %v296_v7 }
 0x17d   :  { %v302_v6 = vpop.permute.xlu1 %301 }
 0x17e   :  { %v367_v33 = vsel %vm267_vm3, %v366_v32, %v302_v6 }
 0x185   :  { %v326_v9 = vpop.permute.xlu2 %325  ;;  %v308_v10 = vpop.permute.xlu1 %307 }
 0x186   :  { %v371_v23 = vsel %vm261_vm0, %v143_v21, %v326_v9  ;;  %v368_v36 = vsel %vm269_vm4, %v367_v33, %v308_v10 }
 0x18d   :  { %v314_v13 = vpop.permute.xlu1 %313 }
 0x18e   :  { %v369_v40 = vsel %vm271_vm5, %v368_v36, %v314_v13 }
 0x19d   :  { %v344_v12 = vpop.permute.xlu2 %343 }
 0x1a5   :  { %v350_v15 = vpop.permute.xlu2 %349  ;;  %v332_v20 = vpop.permute.xlu1 %331 }
 0x1a6   :  { %v372_v25 = vsel %vm263_vm1, %v371_v23, %v332_v20 }
 0x1ad   :  { %v338_v26 = vpop.permute.xlu0 %337  ;;  %v356_v2 = vpop.permute.xlu2 %355 }
 0x1ae   :  { %v373_v1 = vsel %vm265_vm2, %v372_v25, %v338_v26  ;;  %v320_v34 = vpop.permute.xlu1 %319 }
 0x1af   :  { %v374_v31 = vsel %vm267_vm3, %v373_v1, %v344_v12  ;;  %v370_v43 = vsel %vm273_vm6, %v369_v40, %v320_v34 }
 0x1b0   :  { %v375_v37 = vsel %vm269_vm4, %v374_v31, %v350_v15  ;;  %v383_v51 = vrot.slane %v370_v43, 4 }
 0x1b1   :  { %v376_v45 = vsel %vm271_vm5, %v375_v37, %v356_v2 }
 0x1b5   :  { %v259_v44 = vpop.permute.xlu0 %258  ;;  %v362_v47 = vpop.permute.xlu2 %361 }
 0x1b6   :  { %v281_v46 = vsel %vm273_vm6, %v280_v42, %v259_v44  ;;  %v377_v49 = vsel %vm273_vm6, %v376_v45, %v362_v47 }
 0x1b7   :  { %v382_v48 = vrot.slane %v281_v46, 6  ;;  %v384_v52 = vrot.slane %v377_v49, 2 }
 0x1b9   :  { %v386_v53 = vsel %vm385_vm7, %v274_v50, %v382_v48  ;;  %v388_v54 = vsel %vm387_vm8, %v383_v51, %v384_v52 }
 0x1ba   :  { %v390_v55 = vsel %vm389_vm9, %v386_v53, %v388_v54 }
 0x1bb   :  { %392 = vst [vmem:[#allocation5] sm:$0xff] %v390_v55 }
 0x1bc   :  { %403 = dma.vmem_to_hbm [thread:$0]  %s399_s18, 128, %s401_s21, [#allocation4]  }
 0x1bd   :  { %469 = dma.done.wait [#allocation4], 128  }
 0x1be   :  { %470 = vsyncadd [#allocation4], 4294967168 }
 0x1bf   :  { %408 = vsyncpa [#allocation3], 1 }
 0x1c0   :  { %409 = vsyncpa [#allocation4], 1 }

</bundles_post_ra>
